<compile_context>
chip_gen: v7x
topology: tpu7x:2x2x1
jax: 0.10.0
libtpu: 0.0.40
codegen_flags: <defaults>
</compile_context>

<pallas_src>
import functools

import jax
import jax.numpy as jnp
from jax.experimental import pallas as pl
from jax.experimental.pallas import tpu as pltpu

IN_FEATURES = 10   # Titanic frame after dropping PassengerId/Name ~= 10 cols
H1, H2, OUT = 5, 3, 1
BN_EPS = 1e-5
P1, P2 = 0.2, 0.1  # F.dropout probabilities in the original forward

# --- packed-parameter slab layout (one DMA for every weight/bias/BN affine) ---
P_ROWS = H1 + H2 + OUT            # 9
COL_B = IN_FEATURES               # 10: bias column
COL_G = IN_FEATURES + 1           # 11: BN gamma column
COL_BE = IN_FEATURES + 2          # 12: BN beta column
P_COLS = IN_FEATURES + 3          # 13
ROW_L1, ROW_L2, ROW_L3 = 0, H1, H1 + H2


# ----------------------------- kernel helpers -----------------------------

def _affine_vpu(w, b, x):
    """Linear layer on the VPU: w [H, K], b [H, 1], x [K, B] -> [H, B].

    Unrolled over K as broadcast multiply-adds; no MXU push/pop latency.
    """
    h = b  # broadcasts up to [H, B] on the first accumulate
    for k in range(w.shape[1]):
        h = h + w[:, k:k + 1] * x[k:k + 1, :]
    return h


def _batchnorm_train(h, gamma, beta):
    """PyTorch BatchNorm1d training semantics (biased batch variance).

    h [H, B]; gamma/beta [H, 1].  No lane padding -> no validity mask needed.
    """
    mu = jnp.mean(h, axis=1, keepdims=True)
    d = h - mu
    var = jnp.mean(d * d, axis=1, keepdims=True)
    return d * jax.lax.rsqrt(var + BN_EPS) * gamma + beta


def _elu(h):
    # ELU(alpha=1); exp(min(h,0)) keeps the EUP free of inf intermediates.
    return jnp.where(h > 0, h, jnp.exp(jnp.minimum(h, 0.0)) - 1.0)


def _sigmoid(h):
    # Numerically stable logistic with a single divide.
    z = jnp.exp(-jnp.abs(h))
    inv = 1.0 / (1.0 + z)
    return jnp.where(h >= 0, inv, z * inv)


def net_kernel(*refs, train):
    if train:
        x_ref, p_ref, m1_ref, m2_ref, o_ref = refs
    else:
        x_ref, p_ref, o_ref = refs
        m1_ref = m2_ref = None

    # Single load of the packed parameter slab, then static slices.
    P = p_ref[...]                                          # [9, 13]
    w1 = P[ROW_L1:ROW_L1 + H1, 0:IN_FEATURES]               # [5, 10]
    b1 = P[ROW_L1:ROW_L1 + H1, COL_B:COL_B + 1]
    g1 = P[ROW_L1:ROW_L1 + H1, COL_G:COL_G + 1]
    be1 = P[ROW_L1:ROW_L1 + H1, COL_BE:COL_BE + 1]
    w2 = P[ROW_L2:ROW_L2 + H2, 0:H1]                        # [3, 5]
    b2 = P[ROW_L2:ROW_L2 + H2, COL_B:COL_B + 1]
    g2 = P[ROW_L2:ROW_L2 + H2, COL_G:COL_G + 1]
    be2 = P[ROW_L2:ROW_L2 + H2, COL_BE:COL_BE + 1]
    w3 = P[ROW_L3:ROW_L3 + OUT, 0:H2]                       # [1, 3]
    b3 = P[ROW_L3:ROW_L3 + OUT, COL_B:COL_B + 1]

    # dropout(0.2) -> fc1 -> bn1 -> ELU
    x = x_ref[...]                                          # [F, B], batch on lanes
    if train:
        x = x * m1_ref[...]                                 # pre-scaled keep-mask
    h = _affine_vpu(w1, b1, x)                              # [H1, B]
    h = _elu(_batchnorm_train(h, g1, be1))

    # dropout(0.1) -> fc2 -> bn2 -> ELU
    if train:
        h = h * m2_ref[...]
    h = _affine_vpu(w2, b2, h)                              # [H2, B]
    h = _elu(_batchnorm_train(h, g2, be2))

    # fc3 -> sigmoid
    h = _affine_vpu(w3, b3, h)                              # [1, B]
    o_ref[...] = _sigmoid(h)                                # lane-dense store


# ----------------------------- host-side wrappers -----------------------------

def init_params(key):
    """Deterministic PyTorch-style Linear init (U(-1/sqrt(fan_in))) + BN affine."""
    ks = jax.random.split(key, 6)

    def linear(kw, kb, fan_in, fan_out):
        bound = 1.0 / jnp.sqrt(float(fan_in))
        w = jax.random.uniform(kw, (fan_in, fan_out), jnp.float32, -bound, bound)
        b = jax.random.uniform(kb, (1, fan_out), jnp.float32, -bound, bound)
        return w, b

    w1, b1 = linear(ks[0], ks[1], IN_FEATURES, H1)
    w2, b2 = linear(ks[2], ks[3], H1, H2)
    w3, b3 = linear(ks[4], ks[5], H2, OUT)
    g1, be1 = jnp.ones((1, H1), jnp.float32), jnp.zeros((1, H1), jnp.float32)
    g2, be2 = jnp.ones((1, H2), jnp.float32), jnp.zeros((1, H2), jnp.float32)
    return (w1, b1, g1, be1, w2, b2, g2, be2, w3, b3)


def pack_params(params):
    """Pack all weights/biases/BN affines into one f32[P_ROWS, P_COLS] slab."""
    w1, b1, g1, be1, w2, b2, g2, be2, w3, b3 = params
    slab = jnp.zeros((P_ROWS, P_COLS), jnp.float32)
    slab = slab.at[ROW_L1:ROW_L1 + H1, 0:IN_FEATURES].set(w1.T)
    slab = slab.at[ROW_L1:ROW_L1 + H1, COL_B].set(b1.reshape(-1))
    slab = slab.at[ROW_L1:ROW_L1 + H1, COL_G].set(g1.reshape(-1))
    slab = slab.at[ROW_L1:ROW_L1 + H1, COL_BE].set(be1.reshape(-1))
    slab = slab.at[ROW_L2:ROW_L2 + H2, 0:H1].set(w2.T)
    slab = slab.at[ROW_L2:ROW_L2 + H2, COL_B].set(b2.reshape(-1))
    slab = slab.at[ROW_L2:ROW_L2 + H2, COL_G].set(g2.reshape(-1))
    slab = slab.at[ROW_L2:ROW_L2 + H2, COL_BE].set(be2.reshape(-1))
    slab = slab.at[ROW_L3:ROW_L3 + OUT, 0:H2].set(w3.T)
    slab = slab.at[ROW_L3:ROW_L3 + OUT, COL_B].set(b3.reshape(-1))
    return slab


def make_dropout_masks(key, batch):
    """Pre-scaled keep-masks (feature-major) for the two F.dropout calls."""
    k1, k2 = jax.random.split(key)
    m1 = jax.random.bernoulli(k1, 1.0 - P1, (IN_FEATURES, batch))
    m2 = jax.random.bernoulli(k2, 1.0 - P2, (H1, batch))
    return (m1.astype(jnp.float32) * (1.0 / (1.0 - P1)),
            m2.astype(jnp.float32) * (1.0 / (1.0 - P2)))


def _full_spec(a):
    return pl.BlockSpec(a.shape, lambda: (0,) * a.ndim)


def _round8(r):
    return ((r + 7) // 8) * 8


def net_forward_feature_major(x_fm, packed_params, *, dropout_masks=None):
    """x_fm: [IN_FEATURES, B] f32 (feature-major) -> [OUT, B] probabilities."""
    F, B = x_fm.shape
    assert F == IN_FEATURES
    train = dropout_masks is not None

    args = [x_fm.astype(jnp.float32), packed_params.astype(jnp.float32)]
    if train:
        m1, m2 = dropout_masks
        assert m1.shape == (IN_FEATURES, B) and m2.shape == (H1, B)
        args += [m1.astype(jnp.float32), m2.astype(jnp.float32)]

    # VMEM budget, including sublane padding (rows round up to multiples of 8
    # and lanes to multiples of 128 inside VMEM).
    bp_lanes = ((B + 127) // 128) * 128
    rows = _round8(IN_FEATURES) + _round8(H1) + _round8(H2) + _round8(OUT)
    if train:
        rows += _round8(IN_FEATURES) + _round8(H1)
    vmem_bytes = 4 * bp_lanes * rows + 4 * _round8(P_ROWS) * 128
    assert 3 * vmem_bytes < (16 << 20), (
        "batch too large for the single-block (full-batch BatchNorm) kernel; "
        "use a batch-tiled grid with two-pass BN instead")

    call_kwargs = {}
    if jax.default_backend() == "tpu":
        # Explicit scoped-VMEM limit (safe on v5e/v6e/v7x); interpret fallback
        # ignores Mosaic compiler params, so only attach on a real TPU backend.
        call_kwargs["compiler_params"] = pltpu.CompilerParams(
            vmem_limit_bytes=32 * 1024 * 1024)

    out = pl.pallas_call(
        functools.partial(net_kernel, train=train),
        out_shape=jax.ShapeDtypeStruct((OUT, B), jnp.float32),
        in_specs=[_full_spec(a) for a in args],
        out_specs=pl.BlockSpec((OUT, B), lambda: (0, 0)),
        **call_kwargs,
    )(*args)
    return out


def net_forward(x, packed_params, *, dropout_masks=None):
    """x: [B, IN_FEATURES] f32 -> [B, 1] f32 probabilities (module-shaped API).

    The only wrapper work is the tiny [B,10] -> [10,B] transpose (no zero-pad
    materialization) and a free [1,B] -> [B,1] reshape of the output.
    """
    B, F = x.shape
    assert F == IN_FEATURES
    out_fm = net_forward_feature_major(x.T, packed_params,
                                       dropout_masks=dropout_masks)
    return out_fm.reshape(B, OUT)


# ----------------------------- self-test -----------------------------

if __name__ == "__main__":
    key = jax.random.PRNGKey(0)
    k_x, k_p, k_d = jax.random.split(key, 3)

    B = 8
    x = jax.random.normal(k_x, (B, IN_FEATURES), jnp.float32)
    params = init_params(k_p)
    packed = pack_params(params)

    def ref(x, p, m1=None, m2=None):
        w1, b1, g1, be1, w2, b2, g2, be2, w3, b3 = p

        def bn(h, g, be):
            mu = jnp.mean(h, axis=0, keepdims=True)
            var = jnp.mean((h - mu) ** 2, axis=0, keepdims=True)
            return (h - mu) * jax.lax.rsqrt(var + BN_EPS) * g + be

        def elu(h):
            return jnp.where(h > 0, h, jnp.exp(jnp.minimum(h, 0.0)) - 1.0)

        h = x if m1 is None else x * m1.T
        h = elu(bn(h @ w1 + b1, g1, be1))
        h = h if m2 is None else h * m2.T
        h = elu(bn(h @ w2 + b2, g2, be2))
        h = h @ w3 + b3
        return 1.0 / (1.0 + jnp.exp(-h))

    # Deterministic pass (dropout off) vs. pure-JAX reference.
    out = jax.block_until_ready(net_forward(x, packed))
    expected = ref(x, params)
    assert out.shape == (B, OUT)
    assert bool(jnp.all(jnp.isfinite(out)))
    err = float(jnp.max(jnp.abs(out - expected)))
    assert err < 5e-5, err

    # Training-mode pass (F.dropout is always on in the original forward);
    # masks are host-generated, so the kernel can be checked exactly too.
    masks = make_dropout_masks(k_d, B)
    out_tr = jax.block_until_ready(net_forward(x, packed, dropout_masks=masks))
    expected_tr = ref(x, params, *masks)
    assert out_tr.shape == (B, OUT)
    assert bool(jnp.all(jnp.isfinite(out_tr)))
    assert bool(jnp.all((out_tr >= 0.0) & (out_tr <= 1.0)))
    err_tr = float(jnp.max(jnp.abs(out_tr - expected_tr)))
    assert err_tr < 5e-5, err_tr

    print("KERNEL_OK")
</pallas_src>

<mosaic_0001>
module attributes {stable_mosaic.version = 11 : i64} {
  func.func @net_kernel(%arg0: memref<10x8xf32, #tpu.memory_space<vmem>>, %arg1: memref<9x13xf32, #tpu.memory_space<vmem>>, %arg2: memref<1x8xf32, #tpu.memory_space<vmem>>) attributes {dimension_semantics = [], scalar_prefetch = 0 : i64, scratch_operands = 0 : i64, tpu.core_type = #tpu.core_type<tc>} {
    %c0 = arith.constant 0 : index
    %c0_0 = arith.constant 0 : index
    %0 = vector.load %arg1[%c0, %c0_0] : memref<9x13xf32, #tpu.memory_space<vmem>>, vector<9x13xf32>
    %1 = vector.extract_strided_slice %0 {offsets = [0, 0], sizes = [5, 10], strides = [1, 1]} : vector<9x13xf32> to vector<5x10xf32>
    %2 = vector.extract_strided_slice %0 {offsets = [0, 10], sizes = [5, 1], strides = [1, 1]} : vector<9x13xf32> to vector<5x1xf32>
    %3 = vector.extract_strided_slice %0 {offsets = [0, 11], sizes = [5, 1], strides = [1, 1]} : vector<9x13xf32> to vector<5x1xf32>
    %4 = vector.extract_strided_slice %0 {offsets = [0, 12], sizes = [5, 1], strides = [1, 1]} : vector<9x13xf32> to vector<5x1xf32>
    %5 = vector.extract_strided_slice %0 {offsets = [5, 0], sizes = [3, 5], strides = [1, 1]} : vector<9x13xf32> to vector<3x5xf32>
    %6 = vector.extract_strided_slice %0 {offsets = [5, 10], sizes = [3, 1], strides = [1, 1]} : vector<9x13xf32> to vector<3x1xf32>
    %7 = vector.extract_strided_slice %0 {offsets = [5, 11], sizes = [3, 1], strides = [1, 1]} : vector<9x13xf32> to vector<3x1xf32>
    %8 = vector.extract_strided_slice %0 {offsets = [5, 12], sizes = [3, 1], strides = [1, 1]} : vector<9x13xf32> to vector<3x1xf32>
    %9 = vector.extract_strided_slice %0 {offsets = [8, 0], sizes = [1, 3], strides = [1, 1]} : vector<9x13xf32> to vector<1x3xf32>
    %10 = vector.extract_strided_slice %0 {offsets = [8, 10], sizes = [1, 1], strides = [1, 1]} : vector<9x13xf32> to vector<1x1xf32>
    %c0_1 = arith.constant 0 : index
    %c0_2 = arith.constant 0 : index
    %11 = vector.load %arg0[%c0_1, %c0_2] : memref<10x8xf32, #tpu.memory_space<vmem>>, vector<10x8xf32>
    %12 = vector.extract_strided_slice %1 {offsets = [0, 0], sizes = [5, 1], strides = [1, 1]} : vector<5x10xf32> to vector<5x1xf32>
    %13 = vector.extract_strided_slice %11 {offsets = [0, 0], sizes = [1, 8], strides = [1, 1]} : vector<10x8xf32> to vector<1x8xf32>
    %14 = vector.broadcast %12 : vector<5x1xf32> to vector<5x8xf32>
    %15 = vector.broadcast %13 : vector<1x8xf32> to vector<5x8xf32>
    %16 = arith.mulf %14, %15 : vector<5x8xf32>
    %17 = vector.broadcast %2 : vector<5x1xf32> to vector<5x8xf32>
    %18 = arith.addf %17, %16 : vector<5x8xf32>
    %19 = vector.extract_strided_slice %1 {offsets = [0, 1], sizes = [5, 1], strides = [1, 1]} : vector<5x10xf32> to vector<5x1xf32>
    %20 = vector.extract_strided_slice %11 {offsets = [1, 0], sizes = [1, 8], strides = [1, 1]} : vector<10x8xf32> to vector<1x8xf32>
    %21 = vector.broadcast %19 : vector<5x1xf32> to vector<5x8xf32>
    %22 = vector.broadcast %20 : vector<1x8xf32> to vector<5x8xf32>
    %23 = arith.mulf %21, %22 : vector<5x8xf32>
    %24 = arith.addf %18, %23 : vector<5x8xf32>
    %25 = vector.extract_strided_slice %1 {offsets = [0, 2], sizes = [5, 1], strides = [1, 1]} : vector<5x10xf32> to vector<5x1xf32>
    %26 = vector.extract_strided_slice %11 {offsets = [2, 0], sizes = [1, 8], strides = [1, 1]} : vector<10x8xf32> to vector<1x8xf32>
    %27 = vector.broadcast %25 : vector<5x1xf32> to vector<5x8xf32>
    %28 = vector.broadcast %26 : vector<1x8xf32> to vector<5x8xf32>
    %29 = arith.mulf %27, %28 : vector<5x8xf32>
    %30 = arith.addf %24, %29 : vector<5x8xf32>
    %31 = vector.extract_strided_slice %1 {offsets = [0, 3], sizes = [5, 1], strides = [1, 1]} : vector<5x10xf32> to vector<5x1xf32>
    %32 = vector.extract_strided_slice %11 {offsets = [3, 0], sizes = [1, 8], strides = [1, 1]} : vector<10x8xf32> to vector<1x8xf32>
    %33 = vector.broadcast %31 : vector<5x1xf32> to vector<5x8xf32>
    %34 = vector.broadcast %32 : vector<1x8xf32> to vector<5x8xf32>
    %35 = arith.mulf %33, %34 : vector<5x8xf32>
    %36 = arith.addf %30, %35 : vector<5x8xf32>
    %37 = vector.extract_strided_slice %1 {offsets = [0, 4], sizes = [5, 1], strides = [1, 1]} : vector<5x10xf32> to vector<5x1xf32>
    %38 = vector.extract_strided_slice %11 {offsets = [4, 0], sizes = [1, 8], strides = [1, 1]} : vector<10x8xf32> to vector<1x8xf32>
    %39 = vector.broadcast %37 : vector<5x1xf32> to vector<5x8xf32>
    %40 = vector.broadcast %38 : vector<1x8xf32> to vector<5x8xf32>
    %41 = arith.mulf %39, %40 : vector<5x8xf32>
    %42 = arith.addf %36, %41 : vector<5x8xf32>
    %43 = vector.extract_strided_slice %1 {offsets = [0, 5], sizes = [5, 1], strides = [1, 1]} : vector<5x10xf32> to vector<5x1xf32>
    %44 = vector.extract_strided_slice %11 {offsets = [5, 0], sizes = [1, 8], strides = [1, 1]} : vector<10x8xf32> to vector<1x8xf32>
    %45 = vector.broadcast %43 : vector<5x1xf32> to vector<5x8xf32>
    %46 = vector.broadcast %44 : vector<1x8xf32> to vector<5x8xf32>
    %47 = arith.mulf %45, %46 : vector<5x8xf32>
    %48 = arith.addf %42, %47 : vector<5x8xf32>
    %49 = vector.extract_strided_slice %1 {offsets = [0, 6], sizes = [5, 1], strides = [1, 1]} : vector<5x10xf32> to vector<5x1xf32>
    %50 = vector.extract_strided_slice %11 {offsets = [6, 0], sizes = [1, 8], strides = [1, 1]} : vector<10x8xf32> to vector<1x8xf32>
    %51 = vector.broadcast %49 : vector<5x1xf32> to vector<5x8xf32>
    %52 = vector.broadcast %50 : vector<1x8xf32> to vector<5x8xf32>
    %53 = arith.mulf %51, %52 : vector<5x8xf32>
    %54 = arith.addf %48, %53 : vector<5x8xf32>
    %55 = vector.extract_strided_slice %1 {offsets = [0, 7], sizes = [5, 1], strides = [1, 1]} : vector<5x10xf32> to vector<5x1xf32>
    %56 = vector.extract_strided_slice %11 {offsets = [7, 0], sizes = [1, 8], strides = [1, 1]} : vector<10x8xf32> to vector<1x8xf32>
    %57 = vector.broadcast %55 : vector<5x1xf32> to vector<5x8xf32>
    %58 = vector.broadcast %56 : vector<1x8xf32> to vector<5x8xf32>
    %59 = arith.mulf %57, %58 : vector<5x8xf32>
    %60 = arith.addf %54, %59 : vector<5x8xf32>
    %61 = vector.extract_strided_slice %1 {offsets = [0, 8], sizes = [5, 1], strides = [1, 1]} : vector<5x10xf32> to vector<5x1xf32>
    %62 = vector.extract_strided_slice %11 {offsets = [8, 0], sizes = [1, 8], strides = [1, 1]} : vector<10x8xf32> to vector<1x8xf32>
    %63 = vector.broadcast %61 : vector<5x1xf32> to vector<5x8xf32>
    %64 = vector.broadcast %62 : vector<1x8xf32> to vector<5x8xf32>
    %65 = arith.mulf %63, %64 : vector<5x8xf32>
    %66 = arith.addf %60, %65 : vector<5x8xf32>
    %67 = vector.extract_strided_slice %1 {offsets = [0, 9], sizes = [5, 1], strides = [1, 1]} : vector<5x10xf32> to vector<5x1xf32>
    %68 = vector.extract_strided_slice %11 {offsets = [9, 0], sizes = [1, 8], strides = [1, 1]} : vector<10x8xf32> to vector<1x8xf32>
    %69 = vector.broadcast %67 : vector<5x1xf32> to vector<5x8xf32>
    %70 = vector.broadcast %68 : vector<1x8xf32> to vector<5x8xf32>
    %71 = arith.mulf %69, %70 : vector<5x8xf32>
    %72 = arith.addf %66, %71 : vector<5x8xf32>
    %cst = arith.constant dense<0.000000e+00> : vector<5xf32>
    %73 = vector.multi_reduction <add>, %72, %cst [1] : vector<5x8xf32> to vector<5xf32>
    %74 = vector.shape_cast %73 : vector<5xf32> to vector<5x1xf32>
    %cst_3 = arith.constant 8.000000e+00 : f32
    %75 = vector.broadcast %cst_3 : f32 to vector<5x1xf32>
    %76 = arith.divf %74, %75 : vector<5x1xf32>
    %77 = vector.broadcast %76 : vector<5x1xf32> to vector<5x8xf32>
    %78 = arith.subf %72, %77 : vector<5x8xf32>
    %79 = arith.mulf %78, %78 : vector<5x8xf32>
    %cst_4 = arith.constant dense<0.000000e+00> : vector<5xf32>
    %80 = vector.multi_reduction <add>, %79, %cst_4 [1] : vector<5x8xf32> to vector<5xf32>
    %81 = vector.shape_cast %80 : vector<5xf32> to vector<5x1xf32>
    %cst_5 = arith.constant 8.000000e+00 : f32
    %82 = vector.broadcast %cst_5 : f32 to vector<5x1xf32>
    %83 = arith.divf %81, %82 : vector<5x1xf32>
    %cst_6 = arith.constant 9.99999974E-6 : f32
    %84 = vector.broadcast %cst_6 : f32 to vector<5x1xf32>
    %85 = arith.addf %83, %84 : vector<5x1xf32>
    %86 = math.rsqrt %85 : vector<5x1xf32>
    %87 = vector.broadcast %86 : vector<5x1xf32> to vector<5x8xf32>
    %88 = arith.mulf %78, %87 : vector<5x8xf32>
    %89 = vector.broadcast %3 : vector<5x1xf32> to vector<5x8xf32>
    %90 = arith.mulf %88, %89 : vector<5x8xf32>
    %91 = vector.broadcast %4 : vector<5x1xf32> to vector<5x8xf32>
    %92 = arith.addf %90, %91 : vector<5x8xf32>
    %cst_7 = arith.constant 0.000000e+00 : f32
    %93 = vector.broadcast %cst_7 : f32 to vector<5x8xf32>
    %94 = arith.cmpf ogt, %92, %93 : vector<5x8xf32>
    %cst_8 = arith.constant 0.000000e+00 : f32
    %95 = vector.broadcast %cst_8 : f32 to vector<5x8xf32>
    %96 = arith.minimumf %92, %95 : vector<5x8xf32>
    %97 = math.exp %96 : vector<5x8xf32>
    %cst_9 = arith.constant 1.000000e+00 : f32
    %98 = vector.broadcast %cst_9 : f32 to vector<5x8xf32>
    %99 = arith.subf %97, %98 : vector<5x8xf32>
    %100 = arith.select %94, %92, %99 : vector<5x8xi1>, vector<5x8xf32>
    %101 = vector.extract_strided_slice %5 {offsets = [0, 0], sizes = [3, 1], strides = [1, 1]} : vector<3x5xf32> to vector<3x1xf32>
    %102 = vector.extract_strided_slice %100 {offsets = [0, 0], sizes = [1, 8], strides = [1, 1]} : vector<5x8xf32> to vector<1x8xf32>
    %103 = vector.broadcast %101 : vector<3x1xf32> to vector<3x8xf32>
    %104 = vector.broadcast %102 : vector<1x8xf32> to vector<3x8xf32>
    %105 = arith.mulf %103, %104 : vector<3x8xf32>
    %106 = vector.broadcast %6 : vector<3x1xf32> to vector<3x8xf32>
    %107 = arith.addf %106, %105 : vector<3x8xf32>
    %108 = vector.extract_strided_slice %5 {offsets = [0, 1], sizes = [3, 1], strides = [1, 1]} : vector<3x5xf32> to vector<3x1xf32>
    %109 = vector.extract_strided_slice %100 {offsets = [1, 0], sizes = [1, 8], strides = [1, 1]} : vector<5x8xf32> to vector<1x8xf32>
    %110 = vector.broadcast %108 : vector<3x1xf32> to vector<3x8xf32>
    %111 = vector.broadcast %109 : vector<1x8xf32> to vector<3x8xf32>
    %112 = arith.mulf %110, %111 : vector<3x8xf32>
    %113 = arith.addf %107, %112 : vector<3x8xf32>
    %114 = vector.extract_strided_slice %5 {offsets = [0, 2], sizes = [3, 1], strides = [1, 1]} : vector<3x5xf32> to vector<3x1xf32>
    %115 = vector.extract_strided_slice %100 {offsets = [2, 0], sizes = [1, 8], strides = [1, 1]} : vector<5x8xf32> to vector<1x8xf32>
    %116 = vector.broadcast %114 : vector<3x1xf32> to vector<3x8xf32>
    %117 = vector.broadcast %115 : vector<1x8xf32> to vector<3x8xf32>
    %118 = arith.mulf %116, %117 : vector<3x8xf32>
    %119 = arith.addf %113, %118 : vector<3x8xf32>
    %120 = vector.extract_strided_slice %5 {offsets = [0, 3], sizes = [3, 1], strides = [1, 1]} : vector<3x5xf32> to vector<3x1xf32>
    %121 = vector.extract_strided_slice %100 {offsets = [3, 0], sizes = [1, 8], strides = [1, 1]} : vector<5x8xf32> to vector<1x8xf32>
    %122 = vector.broadcast %120 : vector<3x1xf32> to vector<3x8xf32>
    %123 = vector.broadcast %121 : vector<1x8xf32> to vector<3x8xf32>
    %124 = arith.mulf %122, %123 : vector<3x8xf32>
    %125 = arith.addf %119, %124 : vector<3x8xf32>
    %126 = vector.extract_strided_slice %5 {offsets = [0, 4], sizes = [3, 1], strides = [1, 1]} : vector<3x5xf32> to vector<3x1xf32>
    %127 = vector.extract_strided_slice %100 {offsets = [4, 0], sizes = [1, 8], strides = [1, 1]} : vector<5x8xf32> to vector<1x8xf32>
    %128 = vector.broadcast %126 : vector<3x1xf32> to vector<3x8xf32>
    %129 = vector.broadcast %127 : vector<1x8xf32> to vector<3x8xf32>
    %130 = arith.mulf %128, %129 : vector<3x8xf32>
    %131 = arith.addf %125, %130 : vector<3x8xf32>
    %cst_10 = arith.constant dense<0.000000e+00> : vector<3xf32>
    %132 = vector.multi_reduction <add>, %131, %cst_10 [1] : vector<3x8xf32> to vector<3xf32>
    %133 = vector.shape_cast %132 : vector<3xf32> to vector<3x1xf32>
    %cst_11 = arith.constant 8.000000e+00 : f32
    %134 = vector.broadcast %cst_11 : f32 to vector<3x1xf32>
    %135 = arith.divf %133, %134 : vector<3x1xf32>
    %136 = vector.broadcast %135 : vector<3x1xf32> to vector<3x8xf32>
    %137 = arith.subf %131, %136 : vector<3x8xf32>
    %138 = arith.mulf %137, %137 : vector<3x8xf32>
    %cst_12 = arith.constant dense<0.000000e+00> : vector<3xf32>
    %139 = vector.multi_reduction <add>, %138, %cst_12 [1] : vector<3x8xf32> to vector<3xf32>
    %140 = vector.shape_cast %139 : vector<3xf32> to vector<3x1xf32>
    %cst_13 = arith.constant 8.000000e+00 : f32
    %141 = vector.broadcast %cst_13 : f32 to vector<3x1xf32>
    %142 = arith.divf %140, %141 : vector<3x1xf32>
    %cst_14 = arith.constant 9.99999974E-6 : f32
    %143 = vector.broadcast %cst_14 : f32 to vector<3x1xf32>
    %144 = arith.addf %142, %143 : vector<3x1xf32>
    %145 = math.rsqrt %144 : vector<3x1xf32>
    %146 = vector.broadcast %145 : vector<3x1xf32> to vector<3x8xf32>
    %147 = arith.mulf %137, %146 : vector<3x8xf32>
    %148 = vector.broadcast %7 : vector<3x1xf32> to vector<3x8xf32>
    %149 = arith.mulf %147, %148 : vector<3x8xf32>
    %150 = vector.broadcast %8 : vector<3x1xf32> to vector<3x8xf32>
    %151 = arith.addf %149, %150 : vector<3x8xf32>
    %cst_15 = arith.constant 0.000000e+00 : f32
    %152 = vector.broadcast %cst_15 : f32 to vector<3x8xf32>
    %153 = arith.cmpf ogt, %151, %152 : vector<3x8xf32>
    %cst_16 = arith.constant 0.000000e+00 : f32
    %154 = vector.broadcast %cst_16 : f32 to vector<3x8xf32>
    %155 = arith.minimumf %151, %154 : vector<3x8xf32>
    %156 = math.exp %155 : vector<3x8xf32>
    %cst_17 = arith.constant 1.000000e+00 : f32
    %157 = vector.broadcast %cst_17 : f32 to vector<3x8xf32>
    %158 = arith.subf %156, %157 : vector<3x8xf32>
    %159 = arith.select %153, %151, %158 : vector<3x8xi1>, vector<3x8xf32>
    %160 = vector.extract_strided_slice %9 {offsets = [0, 0], sizes = [1, 1], strides = [1, 1]} : vector<1x3xf32> to vector<1x1xf32>
    %161 = vector.extract_strided_slice %159 {offsets = [0, 0], sizes = [1, 8], strides = [1, 1]} : vector<3x8xf32> to vector<1x8xf32>
    %162 = vector.broadcast %160 : vector<1x1xf32> to vector<1x8xf32>
    %163 = arith.mulf %162, %161 : vector<1x8xf32>
    %164 = vector.broadcast %10 : vector<1x1xf32> to vector<1x8xf32>
    %165 = arith.addf %164, %163 : vector<1x8xf32>
    %166 = vector.extract_strided_slice %9 {offsets = [0, 1], sizes = [1, 1], strides = [1, 1]} : vector<1x3xf32> to vector<1x1xf32>
    %167 = vector.extract_strided_slice %159 {offsets = [1, 0], sizes = [1, 8], strides = [1, 1]} : vector<3x8xf32> to vector<1x8xf32>
    %168 = vector.broadcast %166 : vector<1x1xf32> to vector<1x8xf32>
    %169 = arith.mulf %168, %167 : vector<1x8xf32>
    %170 = arith.addf %165, %169 : vector<1x8xf32>
    %171 = vector.extract_strided_slice %9 {offsets = [0, 2], sizes = [1, 1], strides = [1, 1]} : vector<1x3xf32> to vector<1x1xf32>
    %172 = vector.extract_strided_slice %159 {offsets = [2, 0], sizes = [1, 8], strides = [1, 1]} : vector<3x8xf32> to vector<1x8xf32>
    %173 = vector.broadcast %171 : vector<1x1xf32> to vector<1x8xf32>
    %174 = arith.mulf %173, %172 : vector<1x8xf32>
    %175 = arith.addf %170, %174 : vector<1x8xf32>
    %176 = math.absf %175 : vector<1x8xf32>
    %cst_18 = arith.constant 0.000000e+00 : f32
    %177 = vector.broadcast %cst_18 : f32 to vector<1x8xf32>
    %178 = arith.subf %177, %176 : vector<1x8xf32>
    %179 = math.exp %178 : vector<1x8xf32>
    %cst_19 = arith.constant 1.000000e+00 : f32
    %180 = vector.broadcast %cst_19 : f32 to vector<1x8xf32>
    %181 = arith.addf %180, %179 : vector<1x8xf32>
    %cst_20 = arith.constant 1.000000e+00 : f32
    %182 = vector.broadcast %cst_20 : f32 to vector<1x8xf32>
    %183 = arith.divf %182, %181 : vector<1x8xf32>
    %cst_21 = arith.constant 0.000000e+00 : f32
    %184 = vector.broadcast %cst_21 : f32 to vector<1x8xf32>
    %185 = arith.cmpf oge, %175, %184 : vector<1x8xf32>
    %186 = arith.mulf %179, %183 : vector<1x8xf32>
    %187 = arith.select %185, %183, %186 : vector<1x8xi1>, vector<1x8xf32>
    %c0_22 = arith.constant 0 : index
    %c0_23 = arith.constant 0 : index
    %188 = vector.load %arg2[%c0_22, %c0_23] : memref<1x8xf32, #tpu.memory_space<vmem>>, vector<1x8xf32>
    tpu.vector_store %arg2[%c0_22, %c0_23], %187 {strides = array<i32>} : memref<1x8xf32, #tpu.memory_space<vmem>>, vector<1x8xf32>,
    return
  }
}

</mosaic_0001>

<bundles_post_ra>
// kernel: tpu_custom_call.1
= control target key start
LH: loop header
LB: loop body
LE: loop exit
PB: predicated region body
PF: predicated region fallthrough
CT: control target
= control target key end

     0   :  { %v330_v1 = vmov 1   ;;  %v331_v2 = vmov 0   ;;  %s463_s0 = inlined_call_operand.vmem [shape: f32[10,8], index: 0, kind: input, shape index: {}]   ;;  %s464_s1 = inlined_call_operand.vmem [shape: f32[9,13], index: 1, kind: input, shape index: {}]   ;;  %s465_s2 = inlined_call_operand.hbm [shape: f32[1,8], index: 2, kind: output, shape index: {}]  }
   0x1   :  { %v362_v0 = vld [vmem:[%s464_s1] sm:$0xff]  ;;  %278 = vset.pattern.permute.xlu1 %v330_v1  ;;  %276 = vset.pattern.permute.xlu0 %v331_v2 }
   0x2   :  { %7 = vsyncpa [#allocation3], 0  ;;  %32 = vperm.xlu1 %278, %v362_v0   ;;  %18 = vperm.xlu0 %276, %v362_v0   ;;  %v332_v3 = vmov 2   ;;  %v333_v4 = vmov 10   ;;  %v334_v5 = vmov 3   ;;  %v335_v6 = vmov 4  }
   0x3   :  { %v336_v7 = vmov 5   ;;  %v337_v8 = vmov 7   ;;  %v338_v9 = vmov 6   ;;  %v339_v10 = vmov 8   ;;  %v14_v15 = vld [vmem:[%s463_s0] sm:$0xff] }
   0x4   :  { %v340_v11 = vmov 9   ;;  %v21_v12 = vlaneseq  ;;  %v15_v51 = vld [vmem:[%s463_s0 + $0x8] sm:$0x3]  ;;  %vm121_vm0 = vcmask 61440   ;;  %vm182_vm2 = vcmask 64517  }
   0x5   :  { %vm244_vm4 = vcmask 57344  }
   0x6   :  { %279 = vset.pattern.permute.xlu1 %v332_v3  ;;  %277 = vset.pattern.permute.xlu0 %v333_v4  ;;  %v379_v13 = vshrl.u32 %v21_v12, 7 }
   0x7   :  { %42 = vperm.xlu1 %279, %v362_v0   ;;  %27 = vperm.xlu0 %277, %v362_v0  }
   0x8   :  { %v382_v14 = vsub.s32 0, %v379_v13  ;;  %v388_v16 = vsub.s32 1, %v379_v13  ;;  %v47_v20 = vsub.s32 2, %v379_v13  ;;  %v57_v23 = vsub.s32 3, %v379_v13 }
   0x9   :  { %v67_v27 = vsub.s32 4, %v379_v13  ;;  %v77_v34 = vsub.s32 5, %v379_v13  ;;  %v87_v42 = vsub.s32 6, %v379_v13  ;;  %v97_v44 = vsub.s32 7, %v379_v13 }
   0xa   :  { %v24_v17 = vrot.slane %v14_v15, %v382_v14  ;;  %v38_v21 = vrot.slane %v14_v15, %v388_v16  ;;  %v48_v24 = vrot.slane %v14_v15, %v47_v20  ;;  %v58_v30 = vrot.slane %v14_v15, %v57_v23 }
   0xb   :  { %280 = vset.pattern.permute.xlu1 %v334_v5  ;;  %281 = vset.pattern.permute.xlu0 %v335_v6  ;;  %v68_v33 = vrot.slane %v14_v15, %v67_v27  ;;  %v78_v41 = vrot.slane %v14_v15, %v77_v34  ;;  %v88_v47 = vrot.slane %v14_v15, %v87_v42 }
   0xc   :  { %52 = vperm.xlu1 %280, %v362_v0   ;;  %62 = vperm.xlu0 %281, %v362_v0   ;;  %v98_v48 = vrot.slane %v14_v15, %v97_v44  ;;  %v108_v56 = vrot.slane %v15_v51, %v382_v14  ;;  %v118_v60 = vrot.slane %v15_v51, %v388_v16 }
  0x10   :  { %282 = vset.pattern.permute.xlu1 %v336_v7  ;;  %284 = vset.pattern.permute.xlu0 %v337_v8  ;;  %v341_v7 = vmov 11   ;;  %v342_v8 = vmov 12  }
  0x11   :  { %72 = vperm.xlu1 %282, %v362_v0   ;;  %92 = vperm.xlu0 %284, %v362_v0  }
  0x15   :  { %283 = vset.pattern.permute.xlu1 %v338_v9  ;;  %287 = vset.pattern.permute.xlu0 %v341_v7 }
  0x16   :  { %82 = vperm.xlu1 %283, %v362_v0  }
  0x1a   :  { %285 = vset.pattern.permute.xlu1 %v339_v10 }
  0x1b   :  { %102 = vperm.xlu1 %285, %v362_v0  }
  0x1f   :  { %286 = vset.pattern.permute.xlu1 %v340_v11 }
  0x20   :  { %112 = vperm.xlu1 %286, %v362_v0  }
  0x24   :  { %288 = vset.pattern.permute.xlu1 %v342_v8 }
  0x81   :  { %v391_v18 = vpop.permute.xlu1 %32  ;;  %v393_v19 = vpop.permute.xlu0 %18 }
  0x82   :  { %v25_v22 = vmul.f32 %v24_v17, %v393_v19  ;;  %v39_v28 = vmul.f32 %v38_v21, %v391_v18 }
  0x86   :  { %v401_v25 = vpop.permute.xlu1 %42  ;;  %v403_v26 = vpop.permute.xlu0 %27 }
  0x87   :  { %v30_v29 = vadd.f32 %v403_v26, %v25_v22  ;;  %v49_v31 = vmul.f32 %v48_v24, %v401_v25 }
  0x89   :  { %v40_v32 = vadd.f32 %v39_v28, %v30_v29 }
  0x8b   :  { %v414_v35 = vpop.permute.xlu1 %52  ;;  %v50_v36 = vadd.f32 %v49_v31, %v40_v32  ;;  %v416_v37 = vpop.permute.xlu0 %62 }
  0x8c   :  { %v59_v38 = vmul.f32 %v58_v30, %v414_v35  ;;  %v69_v40 = vmul.f32 %v68_v33, %v416_v37 }
  0x8e   :  { %v60_v39 = vadd.f32 %v59_v38, %v50_v36 }
  0x90   :  { %v73_v43 = vpop.permute.xlu1 %72  ;;  %v70_v45 = vadd.f32 %v69_v40, %v60_v39  ;;  %v93_v50 = vpop.permute.xlu0 %92 }
  0x91   :  { %v79_v46 = vmul.f32 %v78_v41, %v73_v43  ;;  %v99_v55 = vmul.f32 %v98_v48, %v93_v50 }
  0x93   :  { %v80_v52 = vadd.f32 %v79_v46, %v70_v45 }
  0x95   :  { %v83_v49 = vpop.permute.xlu1 %82 }
  0x96   :  { %v89_v53 = vmul.f32 %v88_v47, %v83_v49 }
  0x98   :  { %v90_v54 = vadd.f32 %v89_v53, %v80_v52 }
  0x9a   :  { %v103_v57 = vpop.permute.xlu1 %102  ;;  %v100_v58 = vadd.f32 %v99_v55, %v90_v54 }
  0x9b   :  { %v109_v59 = vmul.f32 %v108_v56, %v103_v57 }
  0x9d   :  { %v110_v62 = vadd.f32 %v109_v59, %v100_v58 }
  0x9f   :  { %v113_v61 = vpop.permute.xlu1 %112 }
  0xa0   :  { %v119_v63 = vmul.f32 %v118_v60, %v113_v61 }
  0xa2   :  { %v120_v5 = vadd.f32 %v119_v63, %v110_v62 }
  0xa4   :  { %v122_v6 = vsel %vm121_vm0, %v120_v5, 0.0 }
  0xa5   :  { %123 = vadd.xlane.f32.xlu0 %v122_v6 }
  0xbb   :  { %137 = vperm.xlu0 %287, %v362_v0  }
  0xbf   :  { %290 = vset.pattern.permute.xlu0 %v333_v4 }
 0x132   :  { %v124_v9 = vpop.xlane.xlu0 %123 }
 0x133   :  { %v126_v10 = vmul.f32 0.125, %v124_v9 }
 0x135   :  { %v127_v11 = vsub.f32 %v120_v5, %v126_v10 }
 0x137   :  { %v128_v12 = vmul.f32 %v127_v11, %v127_v11 }
 0x139   :  { %v129_v15 = vsel %vm121_vm0, %v128_v12, 0.0 }
 0x13a   :  { %130 = vadd.xlane.f32.xlu1 %v129_v15  ;;  %v138_v28 = vpop.permute.xlu0 %137 }
 0x14b   :  { %142 = vperm.xlu1 %288, %v362_v0  }
 0x14f   :  { %289 = vset.pattern.permute.xlu1 %v331_v2 }
 0x1c7   :  { %v131_v17 = vpop.xlane.xlu1 %130 }
 0x1c8   :  { %v132_v21 = vmul.f32 0.125, %v131_v17 }
 0x1ca   :  { %v133_v22 = vadd.f32 1e-05, %v132_v21 }
 0x1cb   :  { %v143_v30 = vpop.permute.xlu1 %142 }
 0x1cc   :  { %294 = vrsqrt.f32 %v133_v22 }
 0x1d6   :  { %v295_v24 = vpop.eup %294 }
 0x1d7   :  { %v135_v29 = vmul.f32 %v295_v24, %v127_v11 }
 0x1d9   :  { %v140_v31 = vmul.f32 %v138_v28, %v135_v29 }
 0x1db   :  { %v145_v4 = vadd.f32 %v143_v30, %v140_v31 }
 0x1dd   :  { %v147_v32 = vmin.f32 %v145_v4, 0.0  ;;  %vm146_vm1 = vcmp.gt.f32.partialorder %v145_v4, 0.0 }
 0x1df   :  { %v148_v33 = vmul.f32 1.442695, %v147_v32 }
 0x1e1   :  { %296 = vpow2.f32 %v148_v33 }
 0x1eb   :  { %v297_v34 = vpop.eup %296 }
 0x1ec   :  { %v260_v36 = vadd.f32 -1.0, %v297_v34 }
 0x1ee   :  { %v151_v38 = vsel %vm146_vm1, %v145_v4, %v260_v36 }
 0x1ef   :  { %v155_v0 = vrot.slane %v151_v38, %v382_v14  ;;  %v161_v2 = vrot.slane %v151_v38, %v388_v16  ;;  %v167_v40 = vrot.slane %v151_v38, %v47_v20  ;;  %v173_v43 = vrot.slane %v151_v38, %v57_v23 }
 0x1f0   :  { %v179_v14 = vrot.slane %v151_v38, %v67_v27 }
 0x1f1   :  { %v156_v39 = vmul.f32 %v155_v0, %v393_v19  ;;  %v162_v42 = vmul.f32 %v161_v2, %v391_v18  ;;  %v168_v45 = vmul.f32 %v167_v40, %v401_v25  ;;  %v174_v16 = vmul.f32 %v173_v43, %v414_v35  ;;  %v13_v18 = vld [vmem:[%s464_s1 + $0x8] sm:$0x1]  ;;  %s343_s1 = smov [#allocation2]  }
 0x1f2   :  { %v180_v47 = vmul.f32 %v179_v14, %v416_v37  ;;  %s252_s16 = sshll.u32 %s343_s1, 4  ;;  %s253_s16 = int_to_ptr.vmem [resolvable:$true] %s252_s16 }
 0x1f3   :  { %v157_v41 = vadd.f32 %v156_v39, %v403_v26  ;;  %s306_s17 = scalar_lea.vmem %s253_s16, 16  ;;  %s310_s18 = scalar_lea.vmem %s253_s16, 32 }
 0x1f4   :  { %p307_p0 = scmp.ne.s32.totalorder %s253_s16, %s306_s17  ;;  %p311_p1 = scmp.lt.s32.totalorder %s253_s16, %s253_s16 }
 0x1f5   :  { %v163_v44 = vadd.f32 %v162_v42, %v157_v41  ;;  %p312_p2 = scmp.lt.s32.totalorder %s310_s18, %s306_s17 }
 0x1f7   :  { %v169_v46 = vadd.f32 %v168_v45, %v163_v44  ;;  %p313_p3 = por %p312_p2, %p311_p1 }
 0x1f9   :  { %v175_v19 = vadd.f32 %v174_v16, %v169_v46  ;;  %p314_p4 = pnand %p313_p3, %p307_p0 }
 0x1fb   :  { %v181_v20 = vadd.f32 %v180_v47, %v175_v19 }
 0x1fd   :  { %v183_v26 = vsel %vm182_vm2, %v181_v20, 0.0 }
 0x1fe   :  { %184 = vadd.xlane.f32.xlu1 %v183_v26 }
 0x20f   :  { %206 = vperm.xlu1 %289, %v13_v18  }
 0x213   :  { %291 = vset.pattern.permute.xlu1 %v330_v1 }
 0x214   :  { %219 = vperm.xlu1 %291, %v13_v18  }
 0x218   :  { %292 = vset.pattern.permute.xlu1 %v332_v3 }
 0x219   :  { %227 = vperm.xlu1 %292, %v13_v18  }
 0x28b   :  { %v185_v13 = vpop.xlane.xlu1 %184 }
 0x28c   :  { %v186_v23 = vmul.f32 0.125, %v185_v13 }
 0x28e   :  { %v187_v25 = vsub.f32 %v181_v20, %v186_v23 }
 0x28f   :  { %v207_v55 = vpop.permute.xlu1 %206 }
 0x290   :  { %v188_v27 = vmul.f32 %v187_v25, %v187_v25 }
 0x292   :  { %v189_v35 = vsel %vm182_vm2, %v188_v27, 0.0 }
 0x293   :  { %190 = vadd.xlane.f32.xlu0 %v189_v35  ;;  %v220_v58 = vpop.permute.xlu1 %219 }
 0x298   :  { %v228_v5 = vpop.permute.xlu1 %227 }
 0x2a9   :  { %214 = vperm.xlu0 %290, %v13_v18  }
 0x2ad   :  { %293 = vset.pattern.permute.xlu0 %v332_v3 }
 0x320   :  { %v191_v37 = vpop.xlane.xlu0 %190 }
 0x321   :  { %v192_v48 = vmul.f32 0.125, %v191_v37 }
 0x323   :  { %v193_v49 = vadd.f32 1e-05, %v192_v48 }
 0x325   :  { %298 = vrsqrt.f32 %v193_v49 }
 0x328   :  { %v215_v3 = vpop.permute.xlu0 %214 }
 0x32f   :  { %v299_v50 = vpop.eup %298 }
 0x330   :  { %v195_v51 = vmul.f32 %v299_v50, %v187_v25 }
 0x332   :  { %v196_v1 = vmul.f32 %v195_v51, %v138_v28 }
 0x334   :  { %v197_v52 = vadd.f32 %v196_v1, %v143_v30 }
 0x336   :  { %v199_v53 = vmin.f32 %v197_v52, 0.0  ;;  %vm198_vm3 = vcmp.gt.f32.partialorder %v197_v52, 0.0 }
 0x338   :  { %v200_v54 = vmul.f32 1.442695, %v199_v53 }
 0x33a   :  { %300 = vpow2.f32 %v200_v54 }
 0x344   :  { %v301_v56 = vpop.eup %300 }
 0x345   :  { %v261_v57 = vadd.f32 -1.0, %v301_v56 }
 0x347   :  { %v203_v59 = vsel %vm198_vm3, %v197_v52, %v261_v57 }
 0x348   :  { %v210_v60 = vrot.slane %v203_v59, 5  ;;  %v222_v61 = vrot.slane %v203_v59, 6  ;;  %v230_v63 = vrot.slane %v203_v59, 7 }
 0x34a   :  { %v212_v62 = vmul.f32 %v210_v60, %v207_v55  ;;  %v224_v6 = vmul.f32 %v222_v61, %v220_v58  ;;  %v232_v8 = vmul.f32 %v230_v63, %v228_v5 }
 0x34c   :  { %v217_v7 = vadd.f32 %v215_v3, %v212_v62 }
 0x34e   :  { %v225_v9 = vadd.f32 %v224_v6, %v217_v7 }
 0x350   :  { %v233_v10 = vadd.f32 %v232_v8, %v225_v9 }
 0x352   :  { %v234_v11 = vand.u32 2147483647, %v233_v10  ;;  %vm241_vm5 = vcmp.ge.f32.partialorder %v233_v10, 0.0 }
 0x354   :  { %v235_v12 = vsub.f32 0.0, %v234_v11 }
 0x356   :  { %v236_v15 = vmul.f32 1.442695, %v235_v12 }
 0x358   :  { %302 = vpow2.f32 %v236_v15 }
 0x362   :  { %v303_v17 = vpop.eup %302 }
 0x363   :  { %v238_v21 = vadd.f32 1.0, %v303_v17 }
 0x365   :  { %304 = vrcp.f32 %v238_v21 }
 0x36f   :  { %v305_v22 = vpop.eup %304 }
 0x370   :  { %v242_v24 = vmul.f32 %v305_v22, %v303_v17 }
 0x372   :  { %v243_v28 = vsel %vm241_vm5, %v305_v22, %v242_v24 }
 0x373   :  { %245 = vst.msk [vmem:[#allocation2] sm:$0x1] %vm244_vm4, %v243_v28 }
 0x374   :  { %317 = shalt.err (!%p314_p4)
}
 0x375   :  { %s318_s21 = scalar_lea.hbm %s465_s2, 16 }
 0x376   :  { %p319_p5 = scmp.ne.s32.totalorder %s465_s2, %s318_s21  ;;  %p322_p6 = scmp.lt.u32.totalorder %s318_s21, %s465_s2 }
 0x378   :  { %p324_p7 = pnand %p322_p6, %p319_p5 }
 0x37a   :  { %327 = shalt.err (!%p324_p7)
}
 0x37b   :  { %255 = dma.vmem_to_hbm [thread:$0]  %s253_s16, 16, %s465_s2, [#allocation3]  }
 0x37c   :  { %328 = dma.done.wait [#allocation3], 16  }
 0x37d   :  { %329 = vsyncadd [#allocation3], 4294967280 }
 0x37e   :  { %259 = vsyncpa [#allocation3], 1 }

</bundles_post_ra>
